<compile_context>
chip_gen: v5e
topology: v5e:2x2
jax: 0.10.0
libtpu: 0.0.40
codegen_flags: <defaults>
</compile_context>

<pallas_src>
import jax
import jax.numpy as jnp
import numpy as np
from jax import lax
from jax.experimental import pallas as pl
from jax.experimental.pallas import tpu as pltpu


def tweetcnn_kernel(x_ref, w1_ref, b1_ref, w2_ref, b2_ref, wf_ref, bf_ref,
                    out_ref):
    """One block of TB batch elements per grid step (position-major rows).

    x_ref : (TB*L, Cin)      input, row = l*TB + b (position-major)
    w1_ref: (3, Cin, 128)    conv1 weights, tap-leading [x[l-1], x[l], x[l+1]]
    b1_ref: (1, 128)
    w2_ref: (3, 128, 64)     conv2 weights, tap-leading
    b2_ref: (1, 64)
    wf_ref: (L2*64, 128)     fc weights (torch .view order), classes padded
    bf_ref: (1, 128)         fc bias, padded classes filled with -1e30
    out_ref:(TB, 128)        softmax probabilities (padded classes == 0)
    """
    M, _ = x_ref.shape                          # TB*L rows
    TB, KP = out_ref.shape
    L = M // TB
    L2 = L // 2
    M2 = M // 2
    C1 = w1_ref.shape[2]                        # 128

    # ---- conv1 (k=3, pad=1) + ReLU: taps fused via sublane roll + edge mask.
    # Rolled-in wraparound rows are explicitly zeroed by the (M,1) row masks.
    x = x_ref[...]
    row1 = lax.broadcasted_iota(jnp.int32, (M, 1), 0)
    x_prev = jnp.where(row1 >= TB, pltpu.roll(x, TB, axis=0), 0.0)       # x[l-1]
    x_next = jnp.where(row1 < M - TB, pltpu.roll(x, M - TB, axis=0), 0.0)  # x[l+1]
    y1 = jnp.dot(x_prev, w1_ref[0], preferred_element_type=jnp.float32)
    y1 = y1 + jnp.dot(x, w1_ref[1], preferred_element_type=jnp.float32)
    y1 = y1 + jnp.dot(x_next, w1_ref[2], preferred_element_type=jnp.float32)
    y1 = jnp.maximum(y1 + b1_ref[...], 0.0)                              # (M, 128)

    # ---- MaxPool1d(kernel=2, stride=2): rows are position-major, so pooling
    # is a pairwise max of adjacent TB-row groups (pure relayout, no matmul).
    y1p = y1.reshape(L2, 2 * TB, C1)
    pooled = jnp.maximum(y1p[:, :TB, :], y1p[:, TB:, :]).reshape(M2, C1)

    # ---- conv2 (k=3, pad=1) + ReLU: 3 accumulated (M2,128)x(128,64) dots.
    row2 = lax.broadcasted_iota(jnp.int32, (M2, 1), 0)
    p_prev = jnp.where(row2 >= TB, pltpu.roll(pooled, TB, axis=0), 0.0)
    p_next = jnp.where(row2 < M2 - TB, pltpu.roll(pooled, M2 - TB, axis=0), 0.0)
    y2 = jnp.dot(p_prev, w2_ref[0], preferred_element_type=jnp.float32)
    y2 = y2 + jnp.dot(pooled, w2_ref[1], preferred_element_type=jnp.float32)
    y2 = y2 + jnp.dot(p_next, w2_ref[2], preferred_element_type=jnp.float32)
    y2 = jnp.maximum(y2 + b2_ref[...], 0.0)                              # (M2, 64)

    # ---- flatten + Linear as ONE matmul: z[b, l2*64 + c] = y2[l2*TB + b, c].
    z = jnp.concatenate(
        [y2[l2 * TB:(l2 + 1) * TB, :] for l2 in range(L2)], axis=-1)     # (TB, L2*64)
    logits = (jnp.dot(z, wf_ref[...], preferred_element_type=jnp.float32)
              + bf_ref[...])                                             # (TB, KP)

    # ---- Softmax over classes (padded logits are -1e30 -> exp == 0 in f32).
    m = jnp.max(logits, axis=1, keepdims=True)
    e = jnp.exp(logits - m)
    denom = jnp.sum(e, axis=1, keepdims=True)
    out_ref[...] = e * pl.reciprocal(denom, approx=True)


def tweetcnn_forward(x_ncl, w1_t, b1, w2_t, b2, wf_t, bf, num_classes,
                     batch_block=None):
    """x_ncl: (B, embed_dim, L) torch-layout input; weights in torch layouts.

    batch_block: rows of the batch processed per grid step (must divide B and
      be a multiple of 8).  None => whole batch in one step (best on
      single-TC v5e/v6e: minimizes per-step overhead).  On v7x pass B//2 (or
      any divisor giving >= 2 steps) when B >= 16 so both TensorCores are fed;
      when scaling TB far up on v7x, also set
      pltpu.CompilerParams(vmem_limit_bytes=...) for its 64 MiB VMEM.
    """
    B, Cin, L = x_ncl.shape
    assert L % 2 == 0
    L2 = L // 2
    K = num_classes
    KP = 128                                    # lane-dense padded class dim
    TB = B if batch_block is None else batch_block
    assert B % TB == 0 and TB % 8 == 0
    G = B // TB

    # ---- layout plumbing (wrapper-side, zero FLOPs, no im2col expansion) ----
    # position-major rows within each batch block: row = l*TB + b
    x_lc = jnp.transpose(x_ncl, (0, 2, 1))                        # (B, L, Cin)
    x_k = (x_lc.reshape(G, TB, L, Cin)
               .transpose(0, 2, 1, 3)
               .reshape(G * L * TB, Cin))

    w1c = jnp.transpose(w1_t, (2, 1, 0))                          # (3, Cin, 128)
    w2c = jnp.transpose(w2_t, (2, 1, 0))                          # (3, 128, 64)
    # torch flatten order of conv2 output (B, 64, L2) is c*L2 + l2 ; the kernel
    # operand is ordered l2*64 + c, so permute the fc weight accordingly.
    wfp = jnp.transpose(wf_t.reshape(K, 64, L2), (2, 1, 0)).reshape(L2 * 64, K)
    wfp = jnp.pad(wfp, ((0, 0), (0, KP - K)))                     # zero class pad
    b1r = b1.reshape(1, -1)
    b2r = b2.reshape(1, -1)
    bfp = jnp.pad(bf, (0, KP - K), constant_values=-1e30).reshape(1, KP)

    out = pl.pallas_call(
        tweetcnn_kernel,
        out_shape=jax.ShapeDtypeStruct((B, KP), jnp.float32),
        grid_spec=pltpu.PrefetchScalarGridSpec(
            num_scalar_prefetch=0,
            grid=(G,),
            in_specs=[
                pl.BlockSpec((TB * L, Cin), lambda g: (g, 0)),
                pl.BlockSpec((3, Cin, 128), lambda g: (0, 0, 0)),
                pl.BlockSpec((1, 128), lambda g: (0, 0)),
                pl.BlockSpec((3, 128, 64), lambda g: (0, 0, 0)),
                pl.BlockSpec((1, 64), lambda g: (0, 0)),
                pl.BlockSpec((L2 * 64, KP), lambda g: (0, 0)),
                pl.BlockSpec((1, KP), lambda g: (0, 0)),
            ],
            out_specs=pl.BlockSpec((TB, KP), lambda g: (g, 0)),
        ),
        compiler_params=pltpu.CompilerParams(
            dimension_semantics=("parallel",)),
    )(x_k, w1c, b1r, w2c, b2r, wfp, bfp)
    return out[:, :K]


def reference_forward(x_ncl, w1_t, b1, w2_t, b2, wf_t, bf):
    """Plain-JAX reference matching PyTorch Conv1d/MaxPool1d/Linear/Softmax."""
    def conv1d(x_cl, w_oik, bias):              # x (Cin, L), w (Cout, Cin, 3), pad=1
        L = x_cl.shape[1]
        xp = jnp.pad(x_cl, ((0, 0), (1, 1)))
        out = sum(jnp.einsum('oi,il->ol', w_oik[:, :, t], xp[:, t:t + L])
                  for t in range(3))
        return out + bias[:, None]

    outs = []
    for i in range(x_ncl.shape[0]):
        y1 = jax.nn.relu(conv1d(x_ncl[i], w1_t, b1))                 # (128, L)
        pooled = jnp.max(y1.reshape(y1.shape[0], -1, 2), axis=2)     # (128, L//2)
        y2 = jax.nn.relu(conv1d(pooled, w2_t, b2))                   # (64, L//2)
        flat = y2.reshape(-1)                                        # torch .view order
        logits = wf_t @ flat + bf
        outs.append(jax.nn.softmax(logits))
    return jnp.stack(outs)


if __name__ == "__main__":
    embed_dim, num_classes, batch = 16, 4, 8
    L = embed_dim                  # sequence length must equal embed_dim (fc size)

    key = jax.random.PRNGKey(0)
    ks = jax.random.split(key, 7)
    # deterministic synthetic parameters in torch layouts:
    x = jax.random.normal(ks[0], (batch, embed_dim, L), jnp.float32)
    w1_t = jax.random.normal(ks[1], (128, embed_dim, 3), jnp.float32) * 0.10
    b1 = jax.random.normal(ks[2], (128,), jnp.float32) * 0.10
    w2_t = jax.random.normal(ks[3], (64, 128, 3), jnp.float32) * 0.05
    b2 = jax.random.normal(ks[4], (64,), jnp.float32) * 0.05
    wf_t = jax.random.normal(ks[5], (num_classes, 64 * (embed_dim // 2)),
                             jnp.float32) * 0.05
    bf = jax.random.normal(ks[6], (num_classes,), jnp.float32) * 0.05

    out = tweetcnn_forward(x, w1_t, b1, w2_t, b2, wf_t, bf, num_classes)
    out = jax.block_until_ready(out)

    ref = reference_forward(x, w1_t, b1, w2_t, b2, wf_t, bf)
    np.testing.assert_allclose(np.asarray(out), np.asarray(ref),
                               rtol=1e-3, atol=1e-3)
    print("KERNEL_OK")
</pallas_src>

<mosaic_0001>
module attributes {stable_mosaic.version = 11 : i64} {
  func.func @tweetcnn_kernel(%arg0: i32, %arg1: memref<128x16xf32, #tpu.memory_space<vmem>>, %arg2: memref<3x16x128xf32, #tpu.memory_space<vmem>>, %arg3: memref<1x128xf32, #tpu.memory_space<vmem>>, %arg4: memref<3x128x64xf32, #tpu.memory_space<vmem>>, %arg5: memref<1x64xf32, #tpu.memory_space<vmem>>, %arg6: memref<512x128xf32, #tpu.memory_space<vmem>>, %arg7: memref<1x128xf32, #tpu.memory_space<vmem>>, %arg8: memref<8x128xf32, #tpu.memory_space<vmem>>) attributes {dimension_semantics = [#tpu.dimension_semantics<parallel>], iteration_bounds = array<i64: 1>, scalar_prefetch = 0 : i64, scratch_operands = 0 : i64, tpu.core_type = #tpu.core_type<tc>, window_params = [{transform_indices = @transform_0, window_bounds = array<i64: 128, 16>}, {pipeline_mode = #tpu.pipeline_mode<synchronous>, transform_indices = @transform_1, window_bounds = array<i64: 3, 16, 128>}, {pipeline_mode = #tpu.pipeline_mode<synchronous>, transform_indices = @transform_2, window_bounds = array<i64: 1, 128>}, {pipeline_mode = #tpu.pipeline_mode<synchronous>, transform_indices = @transform_3, window_bounds = array<i64: 3, 128, 64>}, {pipeline_mode = #tpu.pipeline_mode<synchronous>, transform_indices = @transform_4, window_bounds = array<i64: 1, 64>}, {pipeline_mode = #tpu.pipeline_mode<synchronous>, transform_indices = @transform_5, window_bounds = array<i64: 512, 128>}, {pipeline_mode = #tpu.pipeline_mode<synchronous>, transform_indices = @transform_6, window_bounds = array<i64: 1, 128>}, {transform_indices = @transform_7, window_bounds = array<i64: 8, 128>}]} {
    %c0 = arith.constant 0 : index
    %c0_0 = arith.constant 0 : index
    %0 = vector.load %arg1[%c0, %c0_0] : memref<128x16xf32, #tpu.memory_space<vmem>>, vector<128x16xf32>
    %1 = tpu.iota {dimensions = array<i32: 0>} : vector<128x1xi32>
    %c8_i32 = arith.constant 8 : i32
    %2 = vector.broadcast %c8_i32 : i32 to vector<128x1xi32>
    %3 = arith.cmpi sge, %1, %2 : vector<128x1xi32>
    %c8_i32_1 = arith.constant 8 : i32
    %4 = tpu.dynamic_rotate %0 by %c8_i32_1 dim 0 : vector<128x16xf32>, i32 -> vector<128x16xf32>
    %cst = arith.constant 0.000000e+00 : f32
    %5 = vector.shape_cast %3 : vector<128x1xi1> to vector<128x1xi1>
    %6 = vector.broadcast %5 : vector<128x1xi1> to vector<128x16xi1>
    %7 = vector.broadcast %cst : f32 to vector<128x16xf32>
    %8 = arith.select %6, %4, %7 : vector<128x16xi1>, vector<128x16xf32>
    %c120_i32 = arith.constant 120 : i32
    %9 = vector.broadcast %c120_i32 : i32 to vector<128x1xi32>
    %10 = arith.cmpi slt, %1, %9 : vector<128x1xi32>
    %c120_i32_2 = arith.constant 120 : i32
    %11 = tpu.dynamic_rotate %0 by %c120_i32_2 dim 0 : vector<128x16xf32>, i32 -> vector<128x16xf32>
    %cst_3 = arith.constant 0.000000e+00 : f32
    %12 = vector.shape_cast %10 : vector<128x1xi1> to vector<128x1xi1>
    %13 = vector.broadcast %12 : vector<128x1xi1> to vector<128x16xi1>
    %14 = vector.broadcast %cst_3 : f32 to vector<128x16xf32>
    %15 = arith.select %13, %11, %14 : vector<128x16xi1>, vector<128x16xf32>
    %c0_4 = arith.constant 0 : index
    %c0_5 = arith.constant 0 : index
    %c0_6 = arith.constant 0 : index
    %16 = vector.load %arg2[%c0_4, %c0_5, %c0_6] : memref<3x16x128xf32, #tpu.memory_space<vmem>>, vector<1x16x128xf32>
    %17 = vector.shape_cast %16 : vector<1x16x128xf32> to vector<16x128xf32>
    %cst_7 = arith.constant dense<0.000000e+00> : vector<128x128xf32>
    %18 = tpu.matmul %8, %17, %cst_7 {dimension_numbers = #tpu.dot_dimension_numbers<[1], [0], [0], [1], [0, 0, 1, 1], [], []>} : vector<128x16xf32>, vector<16x128xf32>, vector<128x128xf32> -> vector<128x128xf32>
    %c1 = arith.constant 1 : index
    %c0_8 = arith.constant 0 : index
    %c0_9 = arith.constant 0 : index
    %19 = vector.load %arg2[%c1, %c0_8, %c0_9] : memref<3x16x128xf32, #tpu.memory_space<vmem>>, vector<1x16x128xf32>
    %20 = vector.shape_cast %19 : vector<1x16x128xf32> to vector<16x128xf32>
    %cst_10 = arith.constant dense<0.000000e+00> : vector<128x128xf32>
    %21 = tpu.matmul %0, %20, %cst_10 {dimension_numbers = #tpu.dot_dimension_numbers<[1], [0], [0], [1], [0, 0, 1, 1], [], []>} : vector<128x16xf32>, vector<16x128xf32>, vector<128x128xf32> -> vector<128x128xf32>
    %22 = arith.addf %18, %21 : vector<128x128xf32>
    %c2 = arith.constant 2 : index
    %c0_11 = arith.constant 0 : index
    %c0_12 = arith.constant 0 : index
    %23 = vector.load %arg2[%c2, %c0_11, %c0_12] : memref<3x16x128xf32, #tpu.memory_space<vmem>>, vector<1x16x128xf32>
    %24 = vector.shape_cast %23 : vector<1x16x128xf32> to vector<16x128xf32>
    %cst_13 = arith.constant dense<0.000000e+00> : vector<128x128xf32>
    %25 = tpu.matmul %15, %24, %cst_13 {dimension_numbers = #tpu.dot_dimension_numbers<[1], [0], [0], [1], [0, 0, 1, 1], [], []>} : vector<128x16xf32>, vector<16x128xf32>, vector<128x128xf32> -> vector<128x128xf32>
    %26 = arith.addf %22, %25 : vector<128x128xf32>
    %c0_14 = arith.constant 0 : index
    %c0_15 = arith.constant 0 : index
    %27 = vector.load %arg3[%c0_14, %c0_15] : memref<1x128xf32, #tpu.memory_space<vmem>>, vector<1x128xf32>
    %28 = vector.broadcast %27 : vector<1x128xf32> to vector<128x128xf32>
    %29 = arith.addf %26, %28 : vector<128x128xf32>
    %cst_16 = arith.constant 0.000000e+00 : f32
    %30 = vector.broadcast %cst_16 : f32 to vector<128x128xf32>
    %31 = arith.maximumf %29, %30 : vector<128x128xf32>
    %32 = vector.shape_cast %31 : vector<128x128xf32> to vector<8x16x128xf32>
    %33 = vector.extract_strided_slice %32 {offsets = [0, 0, 0], sizes = [8, 8, 128], strides = [1, 1, 1]} : vector<8x16x128xf32> to vector<8x8x128xf32>
    %34 = vector.extract_strided_slice %32 {offsets = [0, 8, 0], sizes = [8, 8, 128], strides = [1, 1, 1]} : vector<8x16x128xf32> to vector<8x8x128xf32>
    %35 = arith.maximumf %33, %34 : vector<8x8x128xf32>
    %36 = vector.shape_cast %35 : vector<8x8x128xf32> to vector<64x128xf32>
    %37 = tpu.iota {dimensions = array<i32: 0>} : vector<64x1xi32>
    %c8_i32_17 = arith.constant 8 : i32
    %38 = vector.broadcast %c8_i32_17 : i32 to vector<64x1xi32>
    %39 = arith.cmpi sge, %37, %38 : vector<64x1xi32>
    %c8_i32_18 = arith.constant 8 : i32
    %40 = tpu.dynamic_rotate %36 by %c8_i32_18 dim 0 : vector<64x128xf32>, i32 -> vector<64x128xf32>
    %cst_19 = arith.constant 0.000000e+00 : f32
    %41 = vector.shape_cast %39 : vector<64x1xi1> to vector<64x1xi1>
    %42 = vector.broadcast %41 : vector<64x1xi1> to vector<64x128xi1>
    %43 = vector.broadcast %cst_19 : f32 to vector<64x128xf32>
    %44 = arith.select %42, %40, %43 : vector<64x128xi1>, vector<64x128xf32>
    %c56_i32 = arith.constant 56 : i32
    %45 = vector.broadcast %c56_i32 : i32 to vector<64x1xi32>
    %46 = arith.cmpi slt, %37, %45 : vector<64x1xi32>
    %c56_i32_20 = arith.constant 56 : i32
    %47 = tpu.dynamic_rotate %36 by %c56_i32_20 dim 0 : vector<64x128xf32>, i32 -> vector<64x128xf32>
    %cst_21 = arith.constant 0.000000e+00 : f32
    %48 = vector.shape_cast %46 : vector<64x1xi1> to vector<64x1xi1>
    %49 = vector.broadcast %48 : vector<64x1xi1> to vector<64x128xi1>
    %50 = vector.broadcast %cst_21 : f32 to vector<64x128xf32>
    %51 = arith.select %49, %47, %50 : vector<64x128xi1>, vector<64x128xf32>
    %c0_22 = arith.constant 0 : index
    %c0_23 = arith.constant 0 : index
    %c0_24 = arith.constant 0 : index
    %52 = vector.load %arg4[%c0_22, %c0_23, %c0_24] : memref<3x128x64xf32, #tpu.memory_space<vmem>>, vector<1x128x64xf32>
    %53 = vector.shape_cast %52 : vector<1x128x64xf32> to vector<128x64xf32>
    %cst_25 = arith.constant dense<0.000000e+00> : vector<64x64xf32>
    %54 = tpu.matmul %44, %53, %cst_25 {dimension_numbers = #tpu.dot_dimension_numbers<[1], [0], [0], [1], [0, 0, 1, 1], [], []>} : vector<64x128xf32>, vector<128x64xf32>, vector<64x64xf32> -> vector<64x64xf32>
    %c1_26 = arith.constant 1 : index
    %c0_27 = arith.constant 0 : index
    %c0_28 = arith.constant 0 : index
    %55 = vector.load %arg4[%c1_26, %c0_27, %c0_28] : memref<3x128x64xf32, #tpu.memory_space<vmem>>, vector<1x128x64xf32>
    %56 = vector.shape_cast %55 : vector<1x128x64xf32> to vector<128x64xf32>
    %cst_29 = arith.constant dense<0.000000e+00> : vector<64x64xf32>
    %57 = tpu.matmul %36, %56, %cst_29 {dimension_numbers = #tpu.dot_dimension_numbers<[1], [0], [0], [1], [0, 0, 1, 1], [], []>} : vector<64x128xf32>, vector<128x64xf32>, vector<64x64xf32> -> vector<64x64xf32>
    %58 = arith.addf %54, %57 : vector<64x64xf32>
    %c2_30 = arith.constant 2 : index
    %c0_31 = arith.constant 0 : index
    %c0_32 = arith.constant 0 : index
    %59 = vector.load %arg4[%c2_30, %c0_31, %c0_32] : memref<3x128x64xf32, #tpu.memory_space<vmem>>, vector<1x128x64xf32>
    %60 = vector.shape_cast %59 : vector<1x128x64xf32> to vector<128x64xf32>
    %cst_33 = arith.constant dense<0.000000e+00> : vector<64x64xf32>
    %61 = tpu.matmul %51, %60, %cst_33 {dimension_numbers = #tpu.dot_dimension_numbers<[1], [0], [0], [1], [0, 0, 1, 1], [], []>} : vector<64x128xf32>, vector<128x64xf32>, vector<64x64xf32> -> vector<64x64xf32>
    %62 = arith.addf %58, %61 : vector<64x64xf32>
    %c0_34 = arith.constant 0 : index
    %c0_35 = arith.constant 0 : index
    %63 = vector.load %arg5[%c0_34, %c0_35] : memref<1x64xf32, #tpu.memory_space<vmem>>, vector<1x64xf32>
    %64 = vector.broadcast %63 : vector<1x64xf32> to vector<64x64xf32>
    %65 = arith.addf %62, %64 : vector<64x64xf32>
    %cst_36 = arith.constant 0.000000e+00 : f32
    %66 = vector.broadcast %cst_36 : f32 to vector<64x64xf32>
    %67 = arith.maximumf %65, %66 : vector<64x64xf32>
    %68 = vector.extract_strided_slice %67 {offsets = [0, 0], sizes = [8, 64], strides = [1, 1]} : vector<64x64xf32> to vector<8x64xf32>
    %69 = vector.extract_strided_slice %67 {offsets = [8, 0], sizes = [8, 64], strides = [1, 1]} : vector<64x64xf32> to vector<8x64xf32>
    %70 = vector.extract_strided_slice %67 {offsets = [16, 0], sizes = [8, 64], strides = [1, 1]} : vector<64x64xf32> to vector<8x64xf32>
    %71 = vector.extract_strided_slice %67 {offsets = [24, 0], sizes = [8, 64], strides = [1, 1]} : vector<64x64xf32> to vector<8x64xf32>
    %72 = vector.extract_strided_slice %67 {offsets = [32, 0], sizes = [8, 64], strides = [1, 1]} : vector<64x64xf32> to vector<8x64xf32>
    %73 = vector.extract_strided_slice %67 {offsets = [40, 0], sizes = [8, 64], strides = [1, 1]} : vector<64x64xf32> to vector<8x64xf32>
    %74 = vector.extract_strided_slice %67 {offsets = [48, 0], sizes = [8, 64], strides = [1, 1]} : vector<64x64xf32> to vector<8x64xf32>
    %75 = vector.extract_strided_slice %67 {offsets = [56, 0], sizes = [8, 64], strides = [1, 1]} : vector<64x64xf32> to vector<8x64xf32>
    %76 = tpu.concatenate %68, %69, %70, %71, %72, %73, %74, %75 in 1 : vector<8x64xf32>, vector<8x64xf32>, vector<8x64xf32>, vector<8x64xf32>, vector<8x64xf32>, vector<8x64xf32>, vector<8x64xf32>, vector<8x64xf32> -> vector<8x512xf32>
    %c0_37 = arith.constant 0 : index
    %c0_38 = arith.constant 0 : index
    %77 = vector.load %arg6[%c0_37, %c0_38] : memref<512x128xf32, #tpu.memory_space<vmem>>, vector<512x128xf32>
    %cst_39 = arith.constant dense<0.000000e+00> : vector<8x128xf32>
    %78 = tpu.matmul %76, %77, %cst_39 {dimension_numbers = #tpu.dot_dimension_numbers<[1], [0], [0], [1], [0, 0, 1, 1], [], []>} : vector<8x512xf32>, vector<512x128xf32>, vector<8x128xf32> -> vector<8x128xf32>
    %c0_40 = arith.constant 0 : index
    %c0_41 = arith.constant 0 : index
    %79 = vector.load %arg7[%c0_40, %c0_41] : memref<1x128xf32, #tpu.memory_space<vmem>>, vector<1x128xf32>
    %80 = vector.broadcast %79 : vector<1x128xf32> to vector<8x128xf32>
    %81 = arith.addf %78, %80 : vector<8x128xf32>
    %cst_42 = arith.constant dense<0xFF800000> : vector<8xf32>
    %82 = vector.multi_reduction <maximumf>, %81, %cst_42 [1] : vector<8x128xf32> to vector<8xf32>
    %83 = vector.shape_cast %82 : vector<8xf32> to vector<8x1xf32>
    %84 = vector.broadcast %83 : vector<8x1xf32> to vector<8x128xf32>
    %85 = arith.subf %81, %84 : vector<8x128xf32>
    %86 = math.exp %85 : vector<8x128xf32>
    %cst_43 = arith.constant dense<0.000000e+00> : vector<8xf32>
    %87 = vector.multi_reduction <add>, %86, %cst_43 [1] : vector<8x128xf32> to vector<8xf32>
    %88 = vector.shape_cast %87 : vector<8xf32> to vector<8x1xf32>
    %89 = tpu.reciprocal %88 {approx = true} : vector<8x1xf32> -> vector<8x1xf32>
    %90 = vector.broadcast %89 : vector<8x1xf32> to vector<8x128xf32>
    %91 = arith.mulf %86, %90 : vector<8x128xf32>
    %c0_44 = arith.constant 0 : index
    %c0_45 = arith.constant 0 : index
    %92 = vector.load %arg8[%c0_44, %c0_45] : memref<8x128xf32, #tpu.memory_space<vmem>>, vector<8x128xf32>
    tpu.vector_store %arg8[%c0_44, %c0_45], %91 {strides = array<i32>} : memref<8x128xf32, #tpu.memory_space<vmem>>, vector<8x128xf32>,
    return
  }
  func.func @transform_0(%arg0: i32) -> (i32, i32) {
    %c0_i32 = arith.constant 0 : i32
    %c0_i32_0 = arith.constant 0 : i32
    return %arg0, %c0_i32 : i32, i32
  }
  func.func @transform_1(%arg0: i32) -> (i32, i32, i32) {
    %c0_i32 = arith.constant 0 : i32
    %c0_i32_0 = arith.constant 0 : i32
    %c0_i32_1 = arith.constant 0 : i32
    %c0_i32_2 = arith.constant 0 : i32
    return %c0_i32, %c0_i32_0, %c0_i32_1 : i32, i32, i32
  }
  func.func @transform_2(%arg0: i32) -> (i32, i32) {
    %c0_i32 = arith.constant 0 : i32
    %c0_i32_0 = arith.constant 0 : i32
    %c0_i32_1 = arith.constant 0 : i32
    return %c0_i32, %c0_i32_0 : i32, i32
  }
  func.func @transform_3(%arg0: i32) -> (i32, i32, i32) {
    %c0_i32 = arith.constant 0 : i32
    %c0_i32_0 = arith.constant 0 : i32
    %c0_i32_1 = arith.constant 0 : i32
    %c0_i32_2 = arith.constant 0 : i32
    return %c0_i32, %c0_i32_0, %c0_i32_1 : i32, i32, i32
  }
  func.func @transform_4(%arg0: i32) -> (i32, i32) {
    %c0_i32 = arith.constant 0 : i32
    %c0_i32_0 = arith.constant 0 : i32
    %c0_i32_1 = arith.constant 0 : i32
    return %c0_i32, %c0_i32_0 : i32, i32
  }
  func.func @transform_5(%arg0: i32) -> (i32, i32) {
    %c0_i32 = arith.constant 0 : i32
    %c0_i32_0 = arith.constant 0 : i32
    %c0_i32_1 = arith.constant 0 : i32
    return %c0_i32, %c0_i32_0 : i32, i32
  }
  func.func @transform_6(%arg0: i32) -> (i32, i32) {
    %c0_i32 = arith.constant 0 : i32
    %c0_i32_0 = arith.constant 0 : i32
    %c0_i32_1 = arith.constant 0 : i32
    return %c0_i32, %c0_i32_0 : i32, i32
  }
  func.func @transform_7(%arg0: i32) -> (i32, i32) {
    %c0_i32 = arith.constant 0 : i32
    %c0_i32_0 = arith.constant 0 : i32
    return %arg0, %c0_i32 : i32, i32
  }
}

</mosaic_0001>

<bundles_post_ra>
// kernel: tpu_custom_call.1
= control target key start
LH: loop header
LB: loop body
LE: loop exit
PB: predicated region body
PF: predicated region fallthrough
CT: control target
= control target key end

     0   :  { %vm193_vm0 = vcmask 130048   ;;  %v1157_v6 = vmov 0.0   ;;  %s1763_s0 = inlined_call_operand.vmem [shape: f32[128,16], index: 0, kind: input, shape index: {}]   ;;  %s1764_s1 = inlined_call_operand.vmem [shape: f32[3,16,128], index: 1, kind: input, shape index: {}]   ;;  %s1765_s2 = inlined_call_operand.vmem [shape: f32[1,128], index: 2, kind: input, shape index: {}]   ;;  %s1766_s3 = inlined_call_operand.vmem [shape: f32[3,128,64], index: 3, kind: input, shape index: {}]   ;;  %s1767_s4 = inlined_call_operand.vmem [shape: f32[1,64], index: 4, kind: input, shape index: {}]   ;;  %s1768_s5 = inlined_call_operand.vmem [shape: f32[512,128], index: 5, kind: input, shape index: {}]   ;;  %s1769_s6 = inlined_call_operand.vmem [shape: f32[1,128], index: 6, kind: input, shape index: {}]   ;;  %s1770_s7 = inlined_call_operand.hbm [shape: f32[8,128], index: 7, kind: output, shape index: {}]  }
   0x1   :  { %v1033_v0 = vld [vmem:[%s1764_s1 + $0x18] sm:$0xff]  ;;  %v189_v1 = vld [vmem:[%s1764_s1 + $0x8] sm:$0xff]  ;;  %v1032_v2 = vld [vmem:[%s1764_s1 + $0x10] sm:$0xff] }
   0x2   :  { %1114 = vmatpush.msra.mxu2 %v1033_v0  ;;  %369 = vmatpush.msra.mxu1 %v189_v1  ;;  %v188_v3 = vld [vmem:[%s1764_s1] sm:$0xff]  ;;  %v1215_v4 = vld [vmem:[%s1763_s0 + $0x68] sm:$0xff] }
   0x3   :  { %v1066_v5 = vld [vmem:[%s1764_s1 + $0x28] sm:$0xff]  ;;  %256 = vmatpush.msra.mxu0 %v1033_v0  ;;  %v27_v7 = vld [vmem:[%s1763_s0] sm:$0xff] }
   0x4   :  { %1115 = vmatpush.msra.mxu2 %v1032_v2  ;;  %370 = vmatpush.msra.mxu1 %v188_v3  ;;  %v1065_v8 = vld [vmem:[%s1764_s1 + $0x20] sm:$0xff] }
   0x5   :  { %1047 = vmatmul.msk.f32.vlgmr.msra.gmra.mxu2 %vm193_vm0, %v1215_v4  ;;  %371 = vmatmul.f32.vlgmr.msra.gmra.mxu1 %v1157_v6 }
   0x6   :  { %485 = vmatpush.msrb.mxu2 %v1066_v5  ;;  %257 = vmatpush.msra.mxu0 %v1032_v2 }
   0x7   :  { %12 = vsyncpa [#allocation3], 0  ;;  %1034 = vmatmul.msk.f32.vlgmr.msra.gmra.mxu0 %vm193_vm0, %v27_v7  ;;  %v1233_v9 = vld [vmem:[%s1763_s0 + $0x70] sm:$0xff]  ;;  %v28_v10 = vld [vmem:[%s1763_s0 + $0x8] sm:$0xff]  ;;  %vm853_vm1 = vcmask 523264   ;;  %s1159_s11 = smov [#allocation2]  }
   0x8   :  { %486 = vmatpush.msrb.mxu2 %v1065_v8  ;;  %v1245_v11 = vld [vmem:[%s1763_s0 + $0x78] sm:$0xff]  ;;  %v29_v12 = vld [vmem:[%s1763_s0 + $0x10] sm:$0xff]  ;;  %v31_v14 = vld [vmem:[%s1763_s0 + $0x20] sm:$0xff]  ;;  %s1021_s12 = sshll.u32 %s1159_s11, 4  ;;  %s1023_s14 = sshll.u32 %s1770_s7, 4  ;;  %s1022_s12 = int_to_ptr.vmem [resolvable:$true] %s1021_s12  ;;  %s1024_s14 = int_to_ptr.hbm [resolvable:$true] %s1023_s14 }
   0x9   :  { %v30_v13 = vld [vmem:[%s1763_s0 + $0x18] sm:$0xff]  ;;  %v32_v15 = vld [vmem:[%s1763_s0 + $0x28] sm:$0xff]  ;;  %v33_v16 = vld [vmem:[%s1763_s0 + $0x30] sm:$0xff] }
   0xa   :  { %v34_v17 = vld [vmem:[%s1763_s0 + $0x38] sm:$0xff]  ;;  %v35_v18 = vld [vmem:[%s1763_s0 + $0x40] sm:$0xff]  ;;  %v36_v19 = vld [vmem:[%s1763_s0 + $0x48] sm:$0xff] }
   0xb   :  { %v37_v20 = vld [vmem:[%s1763_s0 + $0x50] sm:$0xff]  ;;  %v38_v21 = vld [vmem:[%s1763_s0 + $0x58] sm:$0xff]  ;;  %v39_v22 = vld [vmem:[%s1763_s0 + $0x60] sm:$0xff] }
   0xc   :  { %v1097_v23 = vld [vmem:[%s1766_s3 + $0xf8] sm:$0xff]  ;;  %v1096_v24 = vld [vmem:[%s1766_s3 + $0xf0] sm:$0xff]  ;;  %v1095_v25 = vld [vmem:[%s1766_s3 + $0xe8] sm:$0xff] }
   0xd   :  { %1048 = vmatmul.msk.f32.gmra.mxu2 %vm193_vm0, %v1233_v9  ;;  %1050 = vmatmul.msk.f32.gmra.mxu1 %vm193_vm0, %v27_v7  ;;  %v1094_v26 = vld [vmem:[%s1766_s3 + $0xe0] sm:$0xff]  ;;  %v1093_v27 = vld [vmem:[%s1766_s3 + $0xd8] sm:$0xff]  ;;  %v1092_v28 = vld [vmem:[%s1766_s3 + $0xd0] sm:$0xff] }
   0xe   :  { %669 = vmatpush.msra.mxu3 %v1097_v23  ;;  %v1091_v29 = vld [vmem:[%s1766_s3 + $0xc8] sm:$0xff]  ;;  %v1090_v30 = vld [vmem:[%s1766_s3 + $0xc0] sm:$0xff]  ;;  %v1089_v31 = vld [vmem:[%s1766_s3 + $0xb8] sm:$0xff] }
   0xf   :  { %1035 = vmatmul.msk.f32.gmra.mxu0 %vm193_vm0, %v28_v10  ;;  %v1113_v32 = vld [vmem:[%s1766_s3 + $0x178] sm:$0xff]  ;;  %v1088_v34 = vld [vmem:[%s1766_s3 + $0xb0] sm:$0xff]  ;;  %v1087_v37 = vld [vmem:[%s1766_s3 + $0xa8] sm:$0xff] }
  0x10   :  { %670 = vmatpush.msra.mxu3 %v1096_v24  ;;  %768 = vmatpush.msrb.mxu0 %v1113_v32  ;;  %v1112_v35 = vld [vmem:[%s1766_s3 + $0x170] sm:$0xff]  ;;  %v1111_v38 = vld [vmem:[%s1766_s3 + $0x168] sm:$0xff]  ;;  %v1086_v39 = vld [vmem:[%s1766_s3 + $0xa0] sm:$0xff] }
  0x11   :  { %v1110_v40 = vld [vmem:[%s1766_s3 + $0x160] sm:$0xff]  ;;  %v1085_v42 = vld [vmem:[%s1766_s3 + $0x98] sm:$0xff]  ;;  %v1084_v45 = vld [vmem:[%s1766_s3 + $0x90] sm:$0xff] }
  0x12   :  { %671 = vmatpush.msra.mxu3 %v1095_v25  ;;  %769 = vmatpush.msrb.mxu0 %v1112_v35  ;;  %v1109_v43 = vld [vmem:[%s1766_s3 + $0x158] sm:$0xff]  ;;  %v1108_v46 = vld [vmem:[%s1766_s3 + $0x150] sm:$0xff]  ;;  %v1083_v47 = vld [vmem:[%s1766_s3 + $0x88] sm:$0xff] }
  0x13   :  { %v1107_v48 = vld [vmem:[%s1766_s3 + $0x148] sm:$0xff]  ;;  %v1082_v50 = vld [vmem:[%s1766_s3 + $0x80] sm:$0xff]  ;;  %v1105_v53 = vld [vmem:[%s1766_s3 + $0x138] sm:$0xff] }
  0x14   :  { %672 = vmatpush.msra.mxu3 %v1094_v26  ;;  %770 = vmatpush.msrb.mxu0 %v1111_v38  ;;  %v1106_v51 = vld [vmem:[%s1766_s3 + $0x140] sm:$0xff]  ;;  %v1104_v55 = vld [vmem:[%s1766_s3 + $0x130] sm:$0xff]  ;;  %v1103_v56 = vld [vmem:[%s1766_s3 + $0x128] sm:$0xff] }
  0x15   :  { %1049 = vmatmul.msk.f32.gmra.mxu2 %vm193_vm0, %v1245_v11  ;;  %1051 = vmatmul.msk.f32.gmra.mxu1 %vm193_vm0, %v28_v10  ;;  %v1102_v57 = vld [vmem:[%s1766_s3 + $0x120] sm:$0xff]  ;;  %v1101_v60 = vld [vmem:[%s1766_s3 + $0x118] sm:$0xff]  ;;  %v1100_v61 = vld [vmem:[%s1766_s3 + $0x110] sm:$0xff] }
  0x16   :  { %673 = vmatpush.msra.mxu3 %v1093_v27  ;;  %771 = vmatpush.msrb.mxu0 %v1110_v40  ;;  %v1099_v63 = vld [vmem:[%s1766_s3 + $0x108] sm:$0xff]  ;;  %v1098_v0 = vld [vmem:[%s1766_s3 + $0x100] sm:$0xff] }
  0x17   :  { %1036 = vmatmul.msk.f32.gmra.mxu0 %vm193_vm0, %v29_v12  ;;  %v1433_v5 = vld [vmem:[%s1765_s2] ss:$0 sm:$0xff]  ;;  %s1158_s2 = smov 64  }
  0x18   :  { %674 = vmatpush.msra.mxu3 %v1092_v28  ;;  %772 = vmatpush.msrb.mxu0 %v1109_v43 }
  0x1a   :  { %675 = vmatpush.msra.mxu3 %v1091_v29  ;;  %773 = vmatpush.msrb.mxu0 %v1108_v46  ;;  %v650_v46 = vld [vmem:[%s1766_s3 + $0x70] sm:$0xff] }
  0x1c   :  { %676 = vmatpush.msra.mxu3 %v1090_v30  ;;  %774 = vmatpush.msrb.mxu0 %v1107_v48 }
  0x1d   :  { %1052 = vmatmul.msk.f32.gmra.mxu1 %vm193_vm0, %v29_v12  ;;  %1067 = vmatmul.msk.f32.vlgmr.msrb.gmra.mxu2 %vm193_vm0, %v28_v10 }
  0x1e   :  { %677 = vmatpush.msra.mxu3 %v1089_v31  ;;  %775 = vmatpush.msrb.mxu0 %v1106_v51 }
  0x1f   :  { %1037 = vmatmul.msk.f32.gmra.mxu0 %vm193_vm0, %v30_v13 }
  0x20   :  { %678 = vmatpush.msra.mxu3 %v1088_v34  ;;  %776 = vmatpush.msrb.mxu0 %v1105_v53 }
  0x22   :  { %679 = vmatpush.msra.mxu3 %v1087_v37  ;;  %777 = vmatpush.msrb.mxu0 %v1104_v55  ;;  %v649_v55 = vld [vmem:[%s1766_s3 + $0x68] sm:$0xff] }
  0x24   :  { %680 = vmatpush.msra.mxu3 %v1086_v39  ;;  %778 = vmatpush.msrb.mxu0 %v1103_v56  ;;  %v648_v56 = vld [vmem:[%s1766_s3 + $0x60] sm:$0xff] }
  0x25   :  { %1053 = vmatmul.msk.f32.gmra.mxu1 %vm193_vm0, %v30_v13  ;;  %1068 = vmatmul.msk.f32.gmra.mxu2 %vm193_vm0, %v29_v12 }
  0x26   :  { %681 = vmatpush.msra.mxu3 %v1085_v42  ;;  %779 = vmatpush.msrb.mxu0 %v1102_v57 }
  0x27   :  { %1038 = vmatmul.msk.f32.gmra.mxu0 %vm193_vm0, %v31_v14 }
  0x28   :  { %682 = vmatpush.msra.mxu3 %v1084_v45  ;;  %780 = vmatpush.msrb.mxu0 %v1101_v60  ;;  %v651_v45 = vld [vmem:[%s1766_s3 + $0x78] sm:$0xff] }
  0x2a   :  { %683 = vmatpush.msra.mxu3 %v1083_v47  ;;  %781 = vmatpush.msrb.mxu0 %v1100_v61 }
  0x2c   :  { %684 = vmatpush.msra.mxu3 %v1082_v50  ;;  %782 = vmatpush.msrb.mxu0 %v1099_v63 }
  0x2d   :  { %1054 = vmatmul.msk.f32.gmra.mxu1 %vm193_vm0, %v31_v14  ;;  %1069 = vmatmul.msk.f32.gmra.mxu2 %vm193_vm0, %v30_v13 }
  0x2e   :  { %783 = vmatpush.msrb.mxu0 %v1098_v0  ;;  %710 = vmatpush.msrb.mxu3 %v651_v45 }
  0x2f   :  { %1039 = vmatmul.msk.f32.gmra.mxu0 %vm193_vm0, %v32_v15 }
  0x30   :  { %711 = vmatpush.msrb.mxu3 %v650_v46 }
  0x32   :  { %712 = vmatpush.msrb.mxu3 %v649_v55 }
  0x34   :  { %713 = vmatpush.msrb.mxu3 %v648_v56 }
  0x35   :  { %1055 = vmatmul.msk.f32.gmra.mxu1 %vm193_vm0, %v32_v15  ;;  %1070 = vmatmul.msk.f32.gmra.mxu2 %vm193_vm0, %v31_v14 }
  0x37   :  { %1040 = vmatmul.msk.f32.gmra.mxu0 %vm193_vm0, %v33_v16 }
  0x3d   :  { %1056 = vmatmul.msk.f32.gmra.mxu1 %vm193_vm0, %v33_v16  ;;  %1071 = vmatmul.msk.f32.gmra.mxu2 %vm193_vm0, %v32_v15 }
  0x3f   :  { %1041 = vmatmul.msk.f32.gmra.mxu0 %vm193_vm0, %v34_v17 }
  0x45   :  { %1057 = vmatmul.msk.f32.gmra.mxu1 %vm193_vm0, %v34_v17  ;;  %1072 = vmatmul.msk.f32.gmra.mxu2 %vm193_vm0, %v33_v16 }
  0x47   :  { %1042 = vmatmul.msk.f32.gmra.mxu0 %vm193_vm0, %v35_v18 }
  0x4d   :  { %1058 = vmatmul.msk.f32.gmra.mxu1 %vm193_vm0, %v35_v18  ;;  %1073 = vmatmul.msk.f32.gmra.mxu2 %vm193_vm0, %v34_v17 }
  0x4f   :  { %1043 = vmatmul.msk.f32.gmra.mxu0 %vm193_vm0, %v36_v19 }
  0x55   :  { %1059 = vmatmul.msk.f32.gmra.mxu1 %vm193_vm0, %v36_v19  ;;  %1074 = vmatmul.msk.f32.gmra.mxu2 %vm193_vm0, %v35_v18 }
  0x57   :  { %1044 = vmatmul.msk.f32.gmra.mxu0 %vm193_vm0, %v37_v20 }
  0x5d   :  { %1060 = vmatmul.msk.f32.gmra.mxu1 %vm193_vm0, %v37_v20  ;;  %1075 = vmatmul.msk.f32.gmra.mxu2 %vm193_vm0, %v36_v19 }
  0x5f   :  { %1045 = vmatmul.msk.f32.gmra.mxu0 %vm193_vm0, %v38_v21 }
  0x65   :  { %1061 = vmatmul.msk.f32.gmra.mxu1 %vm193_vm0, %v38_v21  ;;  %1076 = vmatmul.msk.f32.gmra.mxu2 %vm193_vm0, %v37_v20 }
  0x67   :  { %1046 = vmatmul.msk.f32.gmra.mxu0 %vm193_vm0, %v39_v22 }
  0x6d   :  { %1062 = vmatmul.msk.f32.gmra.mxu1 %vm193_vm0, %v39_v22  ;;  %1077 = vmatmul.msk.f32.gmra.mxu2 %vm193_vm0, %v38_v21 }
  0x75   :  { %1063 = vmatmul.msk.f32.gmra.mxu1 %vm193_vm0, %v1215_v4  ;;  %1078 = vmatmul.msk.f32.gmra.mxu2 %vm193_vm0, %v39_v22 }
  0x7d   :  { %1064 = vmatmul.msk.f32.gmra.mxu1 %vm193_vm0, %v1233_v9  ;;  %1079 = vmatmul.msk.f32.gmra.mxu2 %vm193_vm0, %v1215_v4 }
  0x82   :  { %v372_v33 = vpop.f32.mrf.mxu1 }
  0x84   :  { %v259_v36 = vpop.f32.mrf.mxu0 }
  0x85   :  { %1080 = vmatmul.msk.f32.gmra.mxu2 %vm193_vm0, %v1233_v9  ;;  %v373_v2 = vadd.f32 %v372_v33, %v259_v36 }
  0x88   :  { %v1373_v41 = vpop.f32.mrf.mxu2 }
  0x8a   :  { %v375_v44 = vpop.f32.mrf.mxu1 }
  0x8c   :  { %v262_v49 = vpop.f32.mrf.mxu0 }
  0x8d   :  { %1081 = vmatmul.msk.f32.gmra.mxu2 %vm193_vm0, %v1245_v11  ;;  %v376_v7 = vadd.f32 %v375_v44, %v262_v49 }
  0x90   :  { %v1401_v52 = vpop.f32.mrf.mxu2 }
  0x92   :  { %v378_v54 = vpop.f32.mrf.mxu1 }
  0x94   :  { %v265_v59 = vpop.f32.mrf.mxu0 }
  0x95   :  { %532 = vmatmul.f32.gmra.mxu2 %v1157_v6  ;;  %v379_v19 = vadd.f32 %v378_v54, %v265_v59 }
  0x98   :  { %v1416_v58 = vpop.f32.mrf.mxu2 }
  0x9a   :  { %v381_v62 = vpop.f32.mrf.mxu1 }
  0x9c   :  { %v268_v3 = vpop.f32.mrf.mxu0 }
  0x9d   :  { %v382_v21 = vadd.f32 %v381_v62, %v268_v3 }
  0xa0   :  { %v488_v1 = vpop.f32.mrf.mxu2 }
  0xa1   :  { %v536_v4 = vadd.f32 %v488_v1, %v373_v2  ;;  %v647_v1 = vld [vmem:[%s1766_s3 + $0x58] sm:$0xff]  ;;  %v646_v2 = vld [vmem:[%s1766_s3 + $0x50] sm:$0xff] }
  0xa2   :  { %v384_v8 = vpop.f32.mrf.mxu1  ;;  %714 = vmatpush.msrb.mxu3 %v647_v1 }
  0xa3   :  { %v556_v10 = vadd.f32 %v1433_v5, %v536_v4 }
  0xa4   :  { %v271_v13 = vpop.f32.mrf.mxu0  ;;  %715 = vmatpush.msrb.mxu3 %v646_v2 }
  0xa5   :  { %v572_v14 = vmax.f32 %v556_v10, 0.0  ;;  %v385_v33 = vadd.f32 %v384_v8, %v271_v13  ;;  %v644_v13 = vld [vmem:[%s1766_s3 + $0x40] sm:$0xff] }
  0xa8   :  { %v491_v9 = vpop.f32.mrf.mxu2 }
  0xa9   :  { %v537_v11 = vadd.f32 %v491_v9, %v376_v7 }
  0xaa   :  { %v387_v17 = vpop.f32.mrf.mxu1 }
  0xab   :  { %v557_v12 = vadd.f32 %v1433_v5, %v537_v11 }
  0xac   :  { %v274_v22 = vpop.f32.mrf.mxu0 }
  0xad   :  { %v573_v15 = vmax.f32 %v557_v12, 0.0  ;;  %v388_v36 = vadd.f32 %v387_v17, %v274_v22  ;;  %v645_v12 = vld [vmem:[%s1766_s3 + $0x48] sm:$0xff] }
  0xae   :  { %716 = vmatpush.msrb.mxu3 %v645_v12 }
  0xaf   :  { %v1437_v16 = vmax.f32 %v572_v14, %v573_v15 }
  0xb0   :  { %v494_v18 = vpop.f32.mrf.mxu2  ;;  %717 = vmatpush.msrb.mxu3 %v644_v13 }
  0xb1   :  { %685 = vmatmul.f32.vlgmr.msra.gmra.mxu3 %v1437_v16  ;;  %v538_v20 = vadd.f32 %v494_v18, %v379_v19 }
  0xb2   :  { %v390_v26 = vpop.f32.mrf.mxu1 }
  0xb3   :  { %v558_v24 = vadd.f32 %v1433_v5, %v538_v20 }
  0xb4   :  { %v277_v32 = vpop.f32.mrf.mxu0 }
  0xb5   :  { %v574_v28 = vmax.f32 %v558_v24, 0.0  ;;  %v391_v50 = vadd.f32 %v390_v26, %v277_v32  ;;  %v642_v24 = vld [vmem:[%s1766_s3 + $0x30] sm:$0xff]  ;;  %v641_v32 = vld [vmem:[%s1766_s3 + $0x28] sm:$0xff] }
  0xb8   :  { %v497_v23 = vpop.f32.mrf.mxu2 }
  0xb9   :  { %v539_v25 = vadd.f32 %v497_v23, %v382_v21  ;;  %v643_v23 = vld [vmem:[%s1766_s3 + $0x38] sm:$0xff] }
  0xba   :  { %v393_v34 = vpop.f32.mrf.mxu1  ;;  %718 = vmatpush.msrb.mxu3 %v643_v23  ;;  %v889_v23 = vld [vmem:[%s1768_s5 + $0xf8] sm:$0xff] }
  0xbb   :  { %v559_v27 = vadd.f32 %v1433_v5, %v539_v25  ;;  %946 = vmatpush.msra.mxu2 %v889_v23 }
  0xbc   :  { %v280_v40 = vpop.f32.mrf.mxu0  ;;  %719 = vmatpush.msrb.mxu3 %v642_v24  ;;  %v873_v24 = vld [vmem:[%s1768_s5 + $0x78] sm:$0xff] }
  0xbd   :  { %v575_v29 = vmax.f32 %v559_v27, 0.0  ;;  %v394_v54 = vadd.f32 %v393_v34, %v280_v40  ;;  %926 = vmatpush.msrb.mxu1 %v873_v24  ;;  %v877_v24 = vld [vmem:[%s1768_s5 + $0x98] sm:$0xff] }
  0xbe   :  { %720 = vmatpush.msrb.mxu3 %v641_v32 }
  0xbf   :  { %v1442_v30 = vmax.f32 %v574_v28, %v575_v29 }
  0xc0   :  { %v500_v31 = vpop.f32.mrf.mxu2 }
  0xc1   :  { %688 = vmatmul.f32.gmra.mxu3 %v1442_v30  ;;  %784 = vmatmul.f32.vlgmr.msrb.gmra.mxu0 %v1442_v30  ;;  %v540_v35 = vadd.f32 %v500_v31, %v385_v33  ;;  %v640_v33 = vld [vmem:[%s1766_s3 + $0x20] sm:$0xff] }
  0xc2   :  { %v396_v47 = vpop.f32.mrf.mxu1  ;;  %721 = vmatpush.msrb.mxu3 %v640_v33  ;;  %v888_v33 = vld [vmem:[%s1768_s5 + $0xf0] sm:$0xff] }
  0xc3   :  { %v560_v38 = vadd.f32 %v1433_v5, %v540_v35  ;;  %947 = vmatpush.msra.mxu2 %v888_v33  ;;  %v859_v33 = vld [vmem:[%s1768_s5 + $0x8] sm:$0xff] }
  0xc4   :  { %v283_v51 = vpop.f32.mrf.mxu0 }
  0xc5   :  { %v576_v43 = vmax.f32 %v560_v38, 0.0  ;;  %v397_v8 = vadd.f32 %v396_v47, %v283_v51  ;;  %v636_v51 = vld [vmem:[%s1766_s3] sm:$0xff] }
  0xc8   :  { %v503_v37 = vpop.f32.mrf.mxu2 }
  0xc9   :  { %v541_v39 = vadd.f32 %v503_v37, %v388_v36 }
  0xca   :  { %v399_v57 = vpop.f32.mrf.mxu1 }
  0xcb   :  { %v561_v42 = vadd.f32 %v1433_v5, %v541_v39 }
  0xcc   :  { %v286_v3 = vpop.f32.mrf.mxu0 }
  0xcd   :  { %v577_v44 = vmax.f32 %v561_v42, 0.0  ;;  %v400_v11 = vadd.f32 %v399_v57, %v286_v3  ;;  %v639_v42 = vld [vmem:[%s1766_s3 + $0x18] sm:$0xff] }
  0xce   :  { %722 = vmatpush.msrb.mxu3 %v639_v42  ;;  %v871_v42 = vld [vmem:[%s1768_s5 + $0x68] sm:$0xff] }
  0xcf   :  { %v1454_v48 = vmax.f32 %v576_v43, %v577_v44  ;;  %v638_v43 = vld [vmem:[%s1766_s3 + $0x10] sm:$0xff] }
  0xd0   :  { %v506_v49 = vpop.f32.mrf.mxu2  ;;  %723 = vmatpush.msrb.mxu3 %v638_v43 }
  0xd1   :  { %691 = vmatmul.f32.gmra.mxu3 %v1454_v48  ;;  %787 = vmatmul.f32.gmra.mxu0 %v1454_v48  ;;  %v542_v53 = vadd.f32 %v506_v49, %v391_v50  ;;  %v637_v50 = vld [vmem:[%s1766_s3 + $0x8] sm:$0xff] }
  0xd2   :  { %v402_v9 = vpop.f32.mrf.mxu1  ;;  %724 = vmatpush.msrb.mxu3 %v637_v50 }
  0xd3   :  { %v562_v60 = vadd.f32 %v1433_v5, %v542_v53 }
  0xd4   :  { %v289_v15 = vpop.f32.mrf.mxu0  ;;  %725 = vmatpush.msrb.mxu3 %v636_v51  ;;  %v886_v51 = vld [vmem:[%s1768_s5 + $0xe0] sm:$0xff] }
  0xd5   :  { %v578_v63 = vmax.f32 %v562_v60, 0.0  ;;  %v403_v27 = vadd.f32 %v402_v9, %v289_v15 }
  0xd8   :  { %v509_v59 = vpop.f32.mrf.mxu2 }
  0xd9   :  { %v543_v61 = vadd.f32 %v509_v59, %v394_v54 }
  0xda   :  { %v405_v20 = vpop.f32.mrf.mxu1 }
  0xdb   :  { %v563_v62 = vadd.f32 %v1433_v5, %v543_v61 }
  0xdc   :  { %v292_v28 = vpop.f32.mrf.mxu0 }
  0xdd   :  { %v579_v0 = vmax.f32 %v563_v62, 0.0  ;;  %v406_v31 = vadd.f32 %v405_v20, %v292_v28 }
  0xdf   :  { %v1472_v4 = vmax.f32 %v578_v63, %v579_v0 }
  0xe0   :  { %v512_v7 = vpop.f32.mrf.mxu2 }
  0xe1   :  { %694 = vmatmul.f32.gmra.mxu3 %v1472_v4  ;;  %790 = vmatmul.f32.gmra.mxu0 %v1472_v4  ;;  %v544_v10 = vadd.f32 %v512_v7, %v397_v8 }
  0xe2   :  { %v408_v34 = vpop.f32.mrf.mxu1 }
  0xe3   :  { %v564_v17 = vadd.f32 %v1433_v5, %v544_v10 }
  0xe4   :  { %v295_v44 = vpop.f32.mrf.mxu0 }
  0xe5   :  { %v580_v21 = vmax.f32 %v564_v17, 0.0  ;;  %v409_v49 = vadd.f32 %v408_v34, %v295_v44  ;;  %v872_v34 = vld [vmem:[%s1768_s5 + $0x70] sm:$0xff] }
  0xe6   :  { %927 = vmatpush.msrb.mxu1 %v872_v34  ;;  %v896_v34 = vld [vmem:[%s1768_s5 + $0x130] sm:$0xff] }
  0xe8   :  { %v515_v14 = vpop.f32.mrf.mxu2  ;;  %928 = vmatpush.msrb.mxu1 %v871_v42 }
  0xe9   :  { %v545_v18 = vadd.f32 %v515_v14, %v400_v11 }
  0xea   :  { %v411_v46 = vpop.f32.mrf.mxu1 }
  0xeb   :  { %v565_v19 = vadd.f32 %v1433_v5, %v545_v18  ;;  %v412_v54 = vadd.f32 %v411_v46, %v1373_v41 }
  0xed   :  { %v581_v22 = vmax.f32 %v565_v19, 0.0 }
  0xef   :  { %v1490_v25 = vmax.f32 %v580_v21, %v581_v22 }
  0xf0   :  { %v518_v26 = vpop.f32.mrf.mxu2 }
  0xf1   :  { %697 = vmatmul.f32.gmra.mxu3 %v1490_v25  ;;  %793 = vmatmul.f32.gmra.mxu0 %v1490_v25  ;;  %v546_v29 = vadd.f32 %v518_v26, %v403_v27 }
  0xf2   :  { %v414_v59 = vpop.f32.mrf.mxu1 }
  0xf3   :  { %v566_v36 = vadd.f32 %v1433_v5, %v546_v29  ;;  %v415_v1 = vadd.f32 %v414_v59, %v1401_v52  ;;  %v868_v59 = vld [vmem:[%s1768_s5 + $0x50] sm:$0xff] }
  0xf5   :  { %v582_v39 = vmax.f32 %v566_v36, 0.0 }
  0xf8   :  { %v521_v35 = vpop.f32.mrf.mxu2 }
  0xf9   :  { %v547_v37 = vadd.f32 %v521_v35, %v406_v31 }
  0xfa   :  { %v417_v2 = vpop.f32.mrf.mxu1 }
  0xfb   :  { %v567_v38 = vadd.f32 %v1433_v5, %v547_v37  ;;  %v418_v7 = vadd.f32 %v417_v2, %v1416_v58  ;;  %v866_v2 = vld [vmem:[%s1768_s5 + $0x40] sm:$0xff] }
  0xfd   :  { %v583_v40 = vmax.f32 %v567_v38, 0.0 }
  0xff   :  { %v593_v45 = vmax.f32 %v582_v39, %v583_v40  ;;  %v887_v40 = vld [vmem:[%s1768_s5 + $0xe8] sm:$0xff] }
 0x100   :  { %v524_v47 = vpop.f32.mrf.mxu2  ;;  %948 = vmatpush.msra.mxu2 %v887_v40 }
 0x101   :  { %700 = vmatmul.f32.gmra.mxu3 %v593_v45  ;;  %796 = vmatmul.f32.gmra.mxu0 %v593_v45  ;;  %v548_v53 = vadd.f32 %v524_v47, %v409_v49 }
 0x102   :  { %949 = vmatpush.msra.mxu2 %v886_v51  ;;  %v917_v51 = vld [vmem:[%s1768_s5 + $0x1d8] sm:$0xff] }
 0x103   :  { %v568_v56 = vadd.f32 %v1433_v5, %v548_v53  ;;  %v870_v53 = vld [vmem:[%s1768_s5 + $0x60] sm:$0xff] }
 0x104   :  { %929 = vmatpush.msrb.mxu1 %v870_v53  ;;  %v892_v53 = vld [vmem:[%s1768_s5 + $0x110] sm:$0xff] }
 0x105   :  { %v584_v61 = vmax.f32 %v568_v56, 0.0 }
 0x108   :  { %v527_v55 = vpop.f32.mrf.mxu2 }
 0x109   :  { %v549_v57 = vadd.f32 %v527_v55, %v412_v54  ;;  %v885_v54 = vld [vmem:[%s1768_s5 + $0xd8] sm:$0xff] }
 0x10a   :  { %v869_v55 = vld [vmem:[%s1768_s5 + $0x58] sm:$0xff]  ;;  %950 = vmatpush.msra.mxu2 %v885_v54  ;;  %v916_v54 = vld [vmem:[%s1768_s5 + $0x1d0] sm:$0xff] }
 0x10b   :  { %v569_v60 = vadd.f32 %v1433_v5, %v549_v57  ;;  %v884_v57 = vld [vmem:[%s1768_s5 + $0xd0] sm:$0xff]  ;;  %930 = vmatpush.msrb.mxu1 %v869_v55  ;;  %v891_v55 = vld [vmem:[%s1768_s5 + $0x108] sm:$0xff] }
 0x10c   :  { %951 = vmatpush.msra.mxu2 %v884_v57  ;;  %v890_v57 = vld [vmem:[%s1768_s5 + $0x100] sm:$0xff] }
 0x10d   :  { %v585_v62 = vmax.f32 %v569_v60, 0.0  ;;  %931 = vmatpush.msrb.mxu1 %v868_v59  ;;  %v914_v59 = vld [vmem:[%s1768_s5 + $0x1c0] sm:$0xff] }
 0x10f   :  { %v594_v63 = vmax.f32 %v584_v61, %v585_v62  ;;  %v883_v61 = vld [vmem:[%s1768_s5 + $0xc8] sm:$0xff] }
 0x110   :  { %v530_v0 = vpop.f32.mrf.mxu2  ;;  %v867_v62 = vld [vmem:[%s1768_s5 + $0x48] sm:$0xff]  ;;  %952 = vmatpush.msra.mxu2 %v883_v61  ;;  %v913_v61 = vld [vmem:[%s1768_s5 + $0x1b8] sm:$0xff] }
 0x111   :  { %703 = vmatmul.f32.gmra.mxu3 %v594_v63  ;;  %799 = vmatmul.f32.gmra.mxu0 %v594_v63  ;;  %v550_v3 = vadd.f32 %v530_v0, %v415_v1  ;;  %v904_v0 = vld [vmem:[%s1768_s5 + $0x170] sm:$0xff]  ;;  %v882_v1 = vld [vmem:[%s1768_s5 + $0xc0] sm:$0xff] }
 0x112   :  { %932 = vmatpush.msrb.mxu1 %v867_v62  ;;  %953 = vmatpush.msra.mxu2 %v882_v1  ;;  %v912_v62 = vld [vmem:[%s1768_s5 + $0x1b0] sm:$0xff]  ;;  %v909_v1 = vld [vmem:[%s1768_s5 + $0x198] sm:$0xff] }
 0x113   :  { %v570_v8 = vadd.f32 %v1433_v5, %v550_v3 }
 0x114   :  { %933 = vmatpush.msrb.mxu1 %v866_v2  ;;  %v908_v2 = vld [vmem:[%s1768_s5 + $0x190] sm:$0xff] }
 0x115   :  { %v586_v11 = vmax.f32 %v570_v8, 0.0 }
 0x118   :  { %v533_v41 = vpop.f32.mrf.mxu2 }
 0x119   :  { %v551_v9 = vadd.f32 %v533_v41, %v418_v7  ;;  %v903_v41 = vld [vmem:[%s1768_s5 + $0x168] sm:$0xff] }
 0x11b   :  { %v571_v10 = vadd.f32 %v1433_v5, %v551_v9  ;;  %v881_v9 = vld [vmem:[%s1768_s5 + $0xb8] sm:$0xff] }
 0x11c   :  { %954 = vmatpush.msra.mxu2 %v881_v9 }
 0x11d   :  { %v587_v12 = vmax.f32 %v571_v10, 0.0  ;;  %v865_v10 = vld [vmem:[%s1768_s5 + $0x38] sm:$0xff] }
 0x11e   :  { %934 = vmatpush.msrb.mxu1 %v865_v10 }
 0x11f   :  { %v595_v13 = vmax.f32 %v586_v11, %v587_v12  ;;  %v902_v11 = vld [vmem:[%s1768_s5 + $0x160] sm:$0xff] }
 0x121   :  { %706 = vmatmul.f32.gmra.mxu3 %v595_v13  ;;  %802 = vmatmul.f32.gmra.mxu0 %v595_v13  ;;  %v880_v13 = vld [vmem:[%s1768_s5 + $0xb0] sm:$0xff] }
 0x122   :  { %955 = vmatpush.msra.mxu2 %v880_v13 }
 0x129   :  { %726 = vmatmul.f32.vlgmr.msrb.gmra.mxu3 %v1157_v6  ;;  %805 = vmatmul.f32.gmra.mxu0 %v1157_v6 }
 0x131   :  { %729 = vmatmul.f32.gmra.mxu3 %v1437_v16 }
 0x134   :  { %v686_v52 = vpop.f32.mrf.mxu3 }
 0x139   :  { %732 = vmatmul.f32.gmra.mxu3 %v1442_v30 }
 0x13e   :  { %v785_v30 = vpop.f32.mrf.mxu0 }
 0x141   :  { %735 = vmatmul.f32.gmra.mxu3 %v1454_v48 }
 0x144   :  { %v689_v58 = vpop.f32.mrf.mxu3 }
 0x149   :  { %738 = vmatmul.f32.gmra.mxu3 %v1472_v4  ;;  %v1537_v4 = vld [vmem:[%s1767_s4] ss:$0 sm:$0xff] }
 0x14e   :  { %v788_v21 = vpop.f32.mrf.mxu0 }
 0x151   :  { %741 = vmatmul.f32.gmra.mxu3 %v1490_v25 }
 0x154   :  { %v692_v5 = vpop.f32.mrf.mxu3 }
 0x159   :  { %744 = vmatmul.f32.gmra.mxu3 %v593_v45 }
 0x15e   :  { %v791_v25 = vpop.f32.mrf.mxu0 }
 0x161   :  { %747 = vmatmul.f32.gmra.mxu3 %v594_v63  ;;  %v905_v63 = vld [vmem:[%s1768_s5 + $0x178] sm:$0xff] }
 0x162   :  { %966 = vmatpush.msra.mxu3 %v905_v63  ;;  %v911_v63 = vld [vmem:[%s1768_s5 + $0x1a8] sm:$0xff] }
 0x164   :  { %v695_v14 = vpop.f32.mrf.mxu3  ;;  %967 = vmatpush.msra.mxu3 %v904_v0  ;;  %v910_v0 = vld [vmem:[%s1768_s5 + $0x1a0] sm:$0xff] }
 0x166   :  { %968 = vmatpush.msra.mxu3 %v903_v41 }
 0x168   :  { %969 = vmatpush.msra.mxu3 %v902_v11 }
 0x16e   :  { %v794_v35 = vpop.f32.mrf.mxu0 }
 0x174   :  { %v698_v15 = vpop.f32.mrf.mxu3 }
 0x17e   :  { %v797_v46 = vpop.f32.mrf.mxu0 }
 0x184   :  { %v1528_v17 = vpop.f32.mrf.mxu3 }
 0x18e   :  { %v800_v3 = vpop.f32.mrf.mxu0 }
 0x194   :  { %v1530_v6 = vpop.f32.mrf.mxu3 }
 0x1a4   :  { %v1532_v16 = vpop.f32.mrf.mxu3 }
 0x1ac   :  { %v727_v18 = vpop.f32.mrf.mxu3 }
 0x1ad   :  { %v728_v48 = vadd.f32 %v727_v18, %v686_v52  ;;  %v864_v52 = vld [vmem:[%s1768_s5 + $0x30] sm:$0xff]  ;;  %v878_v18 = vld [vmem:[%s1768_s5 + $0xa0] sm:$0xff] }
 0x1ae   :  { %935 = vmatpush.msrb.mxu1 %v864_v52 }
 0x1af   :  { %v809_v19 = vadd.f32 %v785_v30, %v728_v48  ;;  %v862_v48 = vld [vmem:[%s1768_s5 + $0x20] sm:$0xff] }
 0x1b1   :  { %v1540_v20 = vadd.f32 %v1537_v4, %v809_v19  ;;  %v803_v19 = vpop.f32.mrf.mxu0 }
 0x1b4   :  { %v730_v22 = vpop.f32.mrf.mxu3 }
 0x1b5   :  { %v731_v28 = vadd.f32 %v730_v22, %v689_v58  ;;  %v901_v58 = vld [vmem:[%s1768_s5 + $0x158] sm:$0xff]  ;;  %v899_v22 = vld [vmem:[%s1768_s5 + $0x148] sm:$0xff] }
 0x1b6   :  { %970 = vmatpush.msra.mxu3 %v901_v58 }
 0x1b7   :  { %v810_v32 = vadd.f32 %v788_v21, %v731_v28  ;;  %v876_v28 = vld [vmem:[%s1768_s5 + $0x90] sm:$0xff] }
 0x1b9   :  { %v822_v39 = vadd.f32 %v1537_v4, %v810_v32 }
 0x1bb   :  { %v830_v44 = vmax.f32 %v822_v39, 0.0 }
 0x1bc   :  { %v733_v26 = vpop.f32.mrf.mxu3 }
 0x1bd   :  { %v734_v27 = vadd.f32 %v733_v26, %v692_v5  ;;  %v898_v26 = vld [vmem:[%s1768_s5 + $0x140] sm:$0xff] }
 0x1bf   :  { %v811_v29 = vadd.f32 %v791_v25, %v734_v27  ;;  %v861_v25 = vld [vmem:[%s1768_s5 + $0x18] sm:$0xff] }
 0x1c1   :  { %v1549_v31 = vadd.f32 %v1537_v4, %v811_v29  ;;  %v897_v29 = vld [vmem:[%s1768_s5 + $0x138] sm:$0xff] }
 0x1c3   :  { %v831_v9 = vmax.f32 %v1549_v31, 0.0 }
 0x1c4   :  { %v736_v36 = vpop.f32.mrf.mxu3 }
 0x1c5   :  { %v737_v37 = vadd.f32 %v736_v36, %v695_v14  ;;  %v879_v14 = vld [vmem:[%s1768_s5 + $0xa8] sm:$0xff] }
 0x1c6   :  { %956 = vmatpush.msra.mxu2 %v879_v14 }
 0x1c7   :  { %v812_v38 = vadd.f32 %v794_v35, %v737_v37  ;;  %v858_v35 = vld [vmem:[%s1768_s5] sm:$0xff]  ;;  %v806_v37 = vpop.f32.mrf.mxu0 }
 0x1c8   :  { %957 = vmatpush.msra.mxu2 %v878_v18 }
 0x1c9   :  { %v824_v43 = vadd.f32 %v1537_v4, %v812_v38  ;;  %v895_v38 = vld [vmem:[%s1768_s5 + $0x128] sm:$0xff] }
 0x1ca   :  { %958 = vmatpush.msra.mxu2 %v877_v24 }
 0x1cb   :  { %v832_v45 = vmax.f32 %v824_v43, 0.0 }
 0x1cc   :  { %v739_v47 = vpop.f32.mrf.mxu3  ;;  %959 = vmatpush.msra.mxu2 %v876_v28 }
 0x1cd   :  { %v740_v49 = vadd.f32 %v739_v47, %v698_v15  ;;  %v1119_v50 = vpack.i.bf16 %v830_v44, %v832_v45  ;;  %v863_v15 = vld [vmem:[%s1768_s5 + $0x28] sm:$0xff]  ;;  %v921_v45 = vld [vmem:[%s1768_s5 + $0x1f8] sm:$0xff] }
 0x1ce   :  { %936 = vmatpush.msrb.mxu1 %v863_v15  ;;  %v875_v44 = vld [vmem:[%s1768_s5 + $0x88] sm:$0xff] }
 0x1cf   :  { %v813_v56 = vadd.f32 %v797_v46, %v740_v49  ;;  %1120 = vrot.lane.b32.xlu0 %v1119_v50, %s1158_s2  ;;  %960 = vmatpush.msra.mxu2 %v875_v44  ;;  %v894_v46 = vld [vmem:[%s1768_s5 + $0x120] sm:$0xff]  ;;  %v919_v47 = vld [vmem:[%s1768_s5 + $0x1e8] sm:$0xff]  ;;  %v893_v50 = vld [vmem:[%s1768_s5 + $0x118] sm:$0xff] }
 0x1d0   :  { %937 = vmatpush.msrb.mxu1 %v862_v48  ;;  %v918_v49 = vld [vmem:[%s1768_s5 + $0x1e0] sm:$0xff] }
 0x1d1   :  { %v1585_v60 = vadd.f32 %v1537_v4, %v813_v56  ;;  %v915_v56 = vld [vmem:[%s1768_s5 + $0x1c8] sm:$0xff] }
 0x1d2   :  { %938 = vmatpush.msrb.mxu1 %v861_v25 }
 0x1d3   :  { %v833_v52 = vmax.f32 %v1585_v60, 0.0 }
 0x1d4   :  { %v742_v7 = vpop.f32.mrf.mxu3 }
 0x1d5   :  { %v743_v8 = vadd.f32 %v742_v7, %v1528_v17  ;;  %v900_v17 = vld [vmem:[%s1768_s5 + $0x150] sm:$0xff]  ;;  %v906_v7 = vld [vmem:[%s1768_s5 + $0x180] sm:$0xff] }
 0x1d6   :  { %971 = vmatpush.msra.mxu3 %v900_v17 }
 0x1d7   :  { %v814_v12 = vadd.f32 %v800_v3, %v743_v8  ;;  %v907_v3 = vld [vmem:[%s1768_s5 + $0x188] sm:$0xff]  ;;  %v829_v8 = vmax.f32 %v1540_v20, 0.0  ;;  %v1126_v20 = vld [vmem:[%s1769_s6] ss:$0 sm:$0xff] }
 0x1d8   :  { %972 = vmatpush.msra.mxu3 %v899_v22 }
 0x1d9   :  { %v826_v5 = vadd.f32 %v1537_v4, %v814_v12 }
 0x1da   :  { %973 = vmatpush.msra.mxu3 %v898_v26 }
 0x1db   :  { %v834_v30 = vmax.f32 %v826_v5, 0.0 }
 0x1dc   :  { %v745_v21 = vpop.f32.mrf.mxu3  ;;  %974 = vmatpush.msra.mxu3 %v897_v29 }
 0x1dd   :  { %v746_v23 = vadd.f32 %v745_v21, %v1530_v6  ;;  %846 = vrot.lane.b32.xlu0 %v834_v30, %s1158_s2  ;;  %v860_v6 = vld [vmem:[%s1768_s5 + $0x10] sm:$0xff] }
 0x1de   :  { %939 = vmatpush.msrb.mxu1 %v860_v6  ;;  %975 = vmatpush.msra.mxu3 %v896_v34 }
 0x1df   :  { %v815_v27 = vadd.f32 %v803_v19, %v746_v23 }
 0x1e0   :  { %940 = vmatpush.msrb.mxu1 %v859_v33  ;;  %976 = vmatpush.msra.mxu3 %v895_v38 }
 0x1e1   :  { %v1667_v32 = vadd.f32 %v1537_v4, %v815_v27 }
 0x1e2   :  { %941 = vmatpush.msrb.mxu1 %v858_v35  ;;  %977 = vmatpush.msra.mxu3 %v894_v46 }
 0x1e3   :  { %v835_v14 = vmax.f32 %v1667_v32, 0.0 }
 0x1e4   :  { %v748_v36 = vpop.f32.mrf.mxu3  ;;  %986 = vmatpush.msra.mxu1 %v921_v45  ;;  %978 = vmatpush.msra.mxu3 %v893_v50 }
 0x1e5   :  { %v749_v39 = vadd.f32 %v748_v36, %v1532_v16  ;;  %v874_v16 = vld [vmem:[%s1768_s5 + $0x80] sm:$0xff] }
 0x1e6   :  { %961 = vmatpush.msra.mxu2 %v874_v16  ;;  %979 = vmatpush.msra.mxu3 %v892_v53 }
 0x1e7   :  { %v816_v40 = vadd.f32 %v806_v37, %v749_v39 }
 0x1e8   :  { %980 = vmatpush.msra.mxu3 %v891_v55 }
 0x1e9   :  { %v828_v42 = vadd.f32 %v1537_v4, %v816_v40  ;;  %v920_v4 = vld [vmem:[%s1768_s5 + $0x1f0] sm:$0xff] }
 0x1ea   :  { %987 = vmatpush.msra.mxu1 %v920_v4  ;;  %981 = vmatpush.msra.mxu3 %v890_v57 }
 0x1eb   :  { %v836_v43 = vmax.f32 %v828_v42, 0.0 }
 0x1ec   :  { %988 = vmatpush.msra.mxu1 %v919_v47 }
 0x1ed   :  { %850 = vrot.lane.b32.xlu1 %v836_v43, %s1158_s2 }
 0x1ee   :  { %989 = vmatpush.msra.mxu1 %v918_v49 }
 0x1f0   :  { %990 = vmatpush.msra.mxu1 %v917_v51 }
 0x1f2   :  { %991 = vmatpush.msra.mxu1 %v916_v54 }
 0x1f4   :  { %992 = vmatpush.msra.mxu1 %v915_v56 }
 0x1f6   :  { %993 = vmatpush.msra.mxu1 %v914_v59 }
 0x1f8   :  { %994 = vmatpush.msra.mxu1 %v913_v61 }
 0x1fa   :  { %995 = vmatpush.msra.mxu1 %v912_v62 }
 0x1fc   :  { %996 = vmatpush.msra.mxu1 %v911_v63 }
 0x1fe   :  { %997 = vmatpush.msra.mxu1 %v910_v0 }
 0x200   :  { %998 = vmatpush.msra.mxu1 %v909_v1 }
 0x202   :  { %999 = vmatpush.msra.mxu1 %v908_v2 }
 0x204   :  { %1000 = vmatpush.msra.mxu1 %v907_v3 }
 0x206   :  { %1001 = vmatpush.msra.mxu1 %v906_v7 }
 0x241   :  { %v1121_v41 = vpop.permute.xlu0 %1120 }
 0x242   :  { %v1123_v10 = vunpack.i.h.bf16 %v1121_v41  ;;  %v1122_v11 = vunpack.i.l.bf16 %v1121_v41 }
 0x244   :  { %v854_v12 = vsel %vm853_vm1, %v829_v8, %v1123_v10  ;;  %v855_v13 = vsel %vm853_vm1, %v831_v9, %v1122_v11 }
 0x245   :  { %942 = vmatmul.f32.vlgmr.msrb.gmra.mxu1 %v854_v12  ;;  %962 = vmatmul.f32.vlgmr.msra.gmra.mxu2 %v855_v13 }
 0x24f   :  { %v847_v58 = vpop.permute.xlu0 %846 }
 0x250   :  { %v856_v5 = vsel %vm853_vm1, %v833_v52, %v847_v58 }
 0x251   :  { %982 = vmatmul.f32.vlgmr.msra.gmra.mxu3 %v856_v5 }
 0x25f   :  { %v851_v15 = vpop.permute.xlu1 %850 }
 0x260   :  { %v857_v17 = vsel %vm853_vm1, %v835_v14, %v851_v15 }
 0x261   :  { %1002 = vmatmul.f32.vlgmr.msra.gmra.mxu1 %v857_v17 }
 0x2c2   :  { %v943_v31 = vpop.f32.mrf.mxu1 }
 0x2c3   :  { %v944_v18 = vadd.f32 %v1126_v20, %v943_v31 }
 0x2c8   :  { %v963_v30 = vpop.f32.mrf.mxu2 }
 0x2c9   :  { %v964_v19 = vadd.f32 %v963_v30, %v944_v18 }
 0x2d4   :  { %v983_v48 = vpop.f32.mrf.mxu3 }
 0x2d5   :  { %v984_v21 = vadd.f32 %v983_v48, %v964_v19 }
 0x2de   :  { %v1003_v22 = vpop.f32.mrf.mxu1 }
 0x2df   :  { %v1004_v60 = vadd.f32 %v1003_v22, %v984_v21 }
 0x2e1   :  { %1006 = vmax.xlane.f32.xlu1 %v1004_v60 }
 0x354   :  { %v1007_v23 = vpop.xlane.xlu1 %1006 }
 0x355   :  { %v1008_v24 = vsub.f32 %v1004_v60, %v1007_v23 }
 0x357   :  { %v1009_v25 = vmul.f32 1.442695, %v1008_v24 }
 0x359   :  { %1127 = vpow2.f32 %v1009_v25 }
 0x35f   :  { %v1128_v26 = vpop.eup %1127 }
 0x360   :  { %1011 = vadd.xlane.f32.xlu2 %v1128_v26 }
 0x3d3   :  { %v1012_v27 = vpop.xlane.xlu2 %1011 }
 0x3d4   :  { %1129 = vrcp.f32 %v1012_v27 }
 0x3da   :  { %v1130_v6 = vpop.eup %1129 }
 0x3db   :  { %v1014_v28 = vmul.f32 %v1130_v6, %v1128_v26 }
 0x3dd   :  { %1015 = vst [vmem:[#allocation2] sm:$0xff] %v1014_v28 }
 0x3de   :  { %1026 = dma.vmem_to_hbm [thread:$0]  %s1022_s12, 128, %s1024_s14, [#allocation3]  }
 0x3df   :  { %1155 = dma.done.wait [#allocation3], 128  }
 0x3e0   :  { %1156 = vsyncadd [#allocation3], 4294967168 }
 0x3e1   :  { %1031 = vsyncpa [#allocation3], 1 }

</bundles_post_ra>
